<compile_context>
chip_gen: v7x
topology: tpu7x:2x2x1
jax: 0.10.0
libtpu: 0.0.40
codegen_flags: <defaults>
</compile_context>

<pallas_src>
import functools

import jax
import jax.numpy as jnp
from jax.experimental import pallas as pl
from jax.experimental.pallas import tpu as pltpu

LANE = 128
VMEM_BUDGET_BYTES = 14 * (1 << 20)   # stay under v5e's 16 MiB default scoped VMEM


def _round_up(x, m):
    return ((x + m - 1) // m) * m


def _pad2d(a, rows, cols):
    r, c = a.shape
    return jnp.pad(a, ((0, rows - r), (0, cols - c)))


def _divisor_tile(n_pad, cap):
    """Largest multiple of LANE that divides n_pad and is <= cap."""
    t = min(cap, n_pad)
    t = (t // LANE) * LANE
    while n_pad % t:
        t -= LANE
    return t


def _pick_tiles(n_pad, f_in_pad, h_pad):
    """Biggest (tm, tk) that divide n_pad and keep double-buffered VMEM in budget."""
    def vmem_bytes(tm, tk):
        return (2 * tm * tk * 2            # Ahat tiles, bf16, double-buffered
                + 2 * tk * f_in_pad * 2    # streamed x/h tiles, bf16, double-buffered
                + 2 * tm * h_pad * 2       # output tiles, bf16, double-buffered
                + tm * f_in_pad * 4        # f32 accumulator scratch
                + f_in_pad * h_pad * 4 + h_pad * 4)    # weights + bias
    tm = _divisor_tile(n_pad, 1024)
    tk = _divisor_tile(n_pad, 2048)
    while vmem_bytes(tm, tk) > VMEM_BUDGET_BYTES and tk > LANE:
        tk = _divisor_tile(n_pad, tk - LANE)
    while vmem_bytes(tm, tk) > VMEM_BUDGET_BYTES and tm > LANE:
        tm = _divisor_tile(n_pad, tm - LANE)
    return tm, tk


# ----------------------------------------------------------------------------
# Kernel 1: one GCNConv layer (layers 1-2), fused:  relu( (Ahat @ x) @ W + b )
# ----------------------------------------------------------------------------
def gcn_conv_kernel(ahat_ref, x_ref, w_ref, b_ref, out_ref, acc_ref, *, apply_relu):
    k = pl.program_id(1)

    @pl.when(k == 0)
    def _():
        acc_ref[...] = jnp.zeros_like(acc_ref)

    # bf16 x bf16 -> f32 accumulation on the MXU.
    acc_ref[...] += jnp.dot(ahat_ref[...], x_ref[...],
                            preferred_element_type=jnp.float32)

    @pl.when(k == pl.num_programs(1) - 1)
    def _():
        h = jnp.dot(acc_ref[...], w_ref[...], preferred_element_type=jnp.float32)
        h = h + b_ref[...]
        if apply_relu:
            h = jnp.maximum(h, 0.0)
        out_ref[...] = h.astype(out_ref.dtype)


def gcn_conv(ahat_bf16, x_bf16, w, b, *, apply_relu, tm, tk):
    n_pad = ahat_bf16.shape[0]
    f_in_pad = x_bf16.shape[1]
    h_pad = w.shape[1]
    grid = (n_pad // tm, n_pad // tk)
    flops = 2 * n_pad * n_pad * f_in_pad + 2 * n_pad * f_in_pad * h_pad
    bytes_accessed = (ahat_bf16.size * 2                      # bf16 Ahat, streamed once
                      + (n_pad // tm) * x_bf16.size * 2       # x re-fetched per row block
                      + w.size * 4 + b.size * 4
                      + n_pad * h_pad * 2)                    # bf16 output
    return pl.pallas_call(
        functools.partial(gcn_conv_kernel, apply_relu=apply_relu),
        out_shape=jax.ShapeDtypeStruct((n_pad, h_pad), jnp.bfloat16),
        grid_spec=pltpu.PrefetchScalarGridSpec(
            num_scalar_prefetch=0,
            grid=grid,
            in_specs=[
                pl.BlockSpec((tm, tk), lambda i, k: (i, k)),          # Ahat tile (bf16)
                pl.BlockSpec((tk, f_in_pad), lambda i, k: (k, 0)),    # x/h rows (bf16)
                pl.BlockSpec((f_in_pad, h_pad), lambda i, k: (0, 0)),  # W (fetched once)
                pl.BlockSpec((1, h_pad), lambda i, k: (0, 0)),        # bias
            ],
            out_specs=pl.BlockSpec((tm, h_pad), lambda i, k: (i, 0)),
            scratch_shapes=[pltpu.VMEM((tm, f_in_pad), jnp.float32)],
        ),
        compiler_params=pltpu.CompilerParams(
            dimension_semantics=("parallel", "arbitrary")),
        cost_estimate=pl.CostEstimate(flops=flops, transcendentals=0,
                                      bytes_accessed=bytes_accessed),
    )(ahat_bf16, x_bf16, w, b)


# ----------------------------------------------------------------------------
# Kernel 2: conv3 fused with global_mean_pool + Linear head + log_softmax.
# h3 never touches HBM; hG accumulates in the resident f32 output block.
# ----------------------------------------------------------------------------
def gcn_conv3_head_kernel(ahat_ref, h_ref, w_ref, b_ref, pool_ref, wl_ref, bl_ref,
                          hg_ref, logp_ref, acc_ref, *, num_classes):
    i = pl.program_id(0)
    k = pl.program_id(1)
    last_i = pl.num_programs(0) - 1
    last_k = pl.num_programs(1) - 1

    @pl.when(jnp.logical_and(i == 0, k == 0))
    def _():
        hg_ref[...] = jnp.zeros_like(hg_ref)

    @pl.when(k == 0)
    def _():
        acc_ref[...] = jnp.zeros_like(acc_ref)

    acc_ref[...] += jnp.dot(ahat_ref[...], h_ref[...],
                            preferred_element_type=jnp.float32)

    @pl.when(k == last_k)
    def _():
        # h3 tile for this row block (no ReLU after conv3), then mean-pool it.
        h3 = jnp.dot(acc_ref[...], w_ref[...], preferred_element_type=jnp.float32)
        h3 = h3 + b_ref[...]
        hg_ref[...] += jnp.dot(pool_ref[...], h3, preferred_element_type=jnp.float32)

    @pl.when(jnp.logical_and(i == last_i, k == last_k))
    def _():
        # Dropout(p=0.5) is the identity in eval mode.
        logits = jnp.dot(hg_ref[...], wl_ref[...], preferred_element_type=jnp.float32)
        logits = logits + bl_ref[...]
        # Mask padded class lanes so they don't perturb the softmax.
        col = jax.lax.broadcasted_iota(jnp.int32, logits.shape, 1)
        logits = jnp.where(col < num_classes, logits, jnp.float32(-1e30))
        m = jnp.max(logits, axis=1, keepdims=True)
        lse = m + jnp.log(jnp.sum(jnp.exp(logits - m), axis=1, keepdims=True))
        logp_ref[...] = logits - lse


def gcn_conv3_head(ahat_bf16, h_bf16, w, b, pool, wl, bl, *, num_classes, tm, tk):
    n_pad = ahat_bf16.shape[0]
    h_in_pad = h_bf16.shape[1]
    h_pad = w.shape[1]
    g_pad = pool.shape[0]
    c_pad = wl.shape[1]
    grid = (n_pad // tm, n_pad // tk)
    flops = (2 * n_pad * n_pad * h_in_pad + 2 * n_pad * h_in_pad * h_pad
             + 2 * g_pad * n_pad * h_pad + 2 * g_pad * h_pad * c_pad)
    bytes_accessed = (ahat_bf16.size * 2
                      + (n_pad // tm) * h_bf16.size * 2
                      + w.size * 4 + b.size * 4
                      + pool.size * 4 + wl.size * 4 + bl.size * 4
                      + g_pad * h_pad * 4 + g_pad * c_pad * 4)
    return pl.pallas_call(
        functools.partial(gcn_conv3_head_kernel, num_classes=num_classes),
        out_shape=(jax.ShapeDtypeStruct((g_pad, h_pad), jnp.float32),
                   jax.ShapeDtypeStruct((g_pad, c_pad), jnp.float32)),
        grid_spec=pltpu.PrefetchScalarGridSpec(
            num_scalar_prefetch=0,
            grid=grid,
            in_specs=[
                pl.BlockSpec((tm, tk), lambda i, k: (i, k)),            # Ahat tile (bf16)
                pl.BlockSpec((tk, h_in_pad), lambda i, k: (k, 0)),      # h2 rows (bf16)
                pl.BlockSpec((h_in_pad, h_pad), lambda i, k: (0, 0)),   # W3
                pl.BlockSpec((1, h_pad), lambda i, k: (0, 0)),          # b3
                pl.BlockSpec((g_pad, tm), lambda i, k: (0, i)),         # pooling cols for row block
                pl.BlockSpec((h_pad, c_pad), lambda i, k: (0, 0)),      # W_lin
                pl.BlockSpec((1, c_pad), lambda i, k: (0, 0)),          # b_lin
            ],
            out_specs=(pl.BlockSpec((g_pad, h_pad), lambda i, k: (0, 0)),
                       pl.BlockSpec((g_pad, c_pad), lambda i, k: (0, 0))),
            scratch_shapes=[pltpu.VMEM((tm, h_in_pad), jnp.float32)],
        ),
        compiler_params=pltpu.CompilerParams(
            dimension_semantics=("arbitrary", "arbitrary")),
        cost_estimate=pl.CostEstimate(flops=flops, transcendentals=g_pad * c_pad,
                                      bytes_accessed=bytes_accessed),
    )(ahat_bf16, h_bf16, w, b, pool, wl, bl)


# ----------------------------------------------------------------------------
# Full forward
# ----------------------------------------------------------------------------
def gcn_forward(x, edge_index, batch, params, *, num_graphs, dim_h, num_classes):
    n, f = x.shape
    (w1, b1), (w2, b2), (w3, b3), (wl, bl) = params

    # N padding decoupled from tile size: 128-granular padding bounds Ahat waste,
    # tiles are chosen separately as large divisors of n_pad.
    n_pad = _round_up(n, LANE)
    f_pad = _round_up(f, LANE)
    h_pad = _round_up(dim_h, LANE)
    c_pad = _round_up(num_classes, LANE)
    g_pad = _round_up(num_graphs, 8)
    tm, tk = _pick_tiles(n_pad, max(f_pad, h_pad), h_pad)

    # Ahat = D^-1/2 (A + I) D^-1/2, dense, stored bf16 (dominant N^2 HBM operand).
    src, dst = edge_index[0], edge_index[1]
    a = jnp.zeros((n, n), jnp.float32).at[dst, src].add(1.0)
    a = a + jnp.eye(n, dtype=jnp.float32)
    deg = jnp.sum(a, axis=1)
    dinv = jnp.where(deg > 0, jax.lax.rsqrt(deg), 0.0)
    ahat = dinv[:, None] * a * dinv[None, :]
    ahat_p = _pad2d(ahat, n_pad, n_pad).astype(jnp.bfloat16)

    # Mean-pooling matrix: P[g, n] = 1/|V_g| iff batch[n] == g (f32 for exact means).
    counts = jnp.zeros((num_graphs,), jnp.float32).at[batch].add(1.0)
    inv_counts = jnp.where(counts > 0, 1.0 / counts, 0.0)
    pool = jnp.zeros((num_graphs, n), jnp.float32)
    pool = pool.at[batch, jnp.arange(n)].set(inv_counts[batch])
    pool_p = _pad2d(pool, g_pad, n_pad)

    # Zero-padded operands; activations bf16 end-to-end, weights/bias f32.
    x_p = _pad2d(x, n_pad, f_pad).astype(jnp.bfloat16)
    w1_p, b1_p = _pad2d(w1, f_pad, h_pad), _pad2d(b1, 1, h_pad)
    w2_p, b2_p = _pad2d(w2, h_pad, h_pad), _pad2d(b2, 1, h_pad)
    w3_p, b3_p = _pad2d(w3, h_pad, h_pad), _pad2d(b3, 1, h_pad)
    wl_p, bl_p = _pad2d(wl, h_pad, c_pad), _pad2d(bl, 1, c_pad)

    h1 = gcn_conv(ahat_p, x_p, w1_p, b1_p, apply_relu=True, tm=tm, tk=tk)
    h2 = gcn_conv(ahat_p, h1, w2_p, b2_p, apply_relu=True, tm=tm, tk=tk)
    hg_p, logp_p = gcn_conv3_head(ahat_p, h2, w3_p, b3_p, pool_p, wl_p, bl_p,
                                  num_classes=num_classes, tm=tm, tk=tk)
    return hg_p[:num_graphs, :dim_h], logp_p[:num_graphs, :num_classes]


# ----------------------------------------------------------------------------
# Pure-JAX reference (f32, dense) for a sanity check
# ----------------------------------------------------------------------------
def gcn_reference(x, edge_index, batch, params, *, num_graphs):
    n = x.shape[0]
    src, dst = edge_index[0], edge_index[1]
    a = jnp.zeros((n, n), jnp.float32).at[dst, src].add(1.0) + jnp.eye(n)
    deg = jnp.sum(a, axis=1)
    dinv = jnp.where(deg > 0, jax.lax.rsqrt(deg), 0.0)
    ahat = dinv[:, None] * a * dinv[None, :]
    (w1, b1), (w2, b2), (w3, b3), (wl, bl) = params
    h = jnp.maximum(ahat @ (x @ w1) + b1, 0.0)
    h = jnp.maximum(ahat @ (h @ w2) + b2, 0.0)
    h = ahat @ (h @ w3) + b3
    counts = jnp.zeros((num_graphs,), jnp.float32).at[batch].add(1.0)
    hg = jnp.zeros((num_graphs, h.shape[1]), jnp.float32).at[batch].add(h)
    hg = hg / counts[:, None]
    logits = hg @ wl + bl
    return hg, jax.nn.log_softmax(logits, axis=1)


def make_linear(key, f_in, f_out):
    kw, kb = jax.random.split(key)
    w = jax.random.normal(kw, (f_in, f_out), jnp.float32) * (1.0 / jnp.sqrt(f_in))
    b = jax.random.normal(kb, (1, f_out), jnp.float32) * 0.01
    return w, b


if __name__ == "__main__":
    NUM_NODES = 8
    NUM_NODE_FEATURES = 4
    DIM_H = 32
    NUM_CLASSES = 3
    NUM_GRAPHS = 2

    key = jax.random.PRNGKey(0)
    kx, k1, k2, k3, k4 = jax.random.split(key, 5)

    x = jax.random.normal(kx, (NUM_NODES, NUM_NODE_FEATURES), jnp.float32)
    # Two small graphs: nodes 0-3 (graph 0), nodes 4-7 (graph 1); undirected edges
    # stored in both directions.
    edge_src = jnp.array([0, 1, 1, 2, 2, 3, 0, 3, 4, 5, 5, 6, 6, 7, 4, 7], jnp.int32)
    edge_dst = jnp.array([1, 0, 2, 1, 3, 2, 3, 0, 5, 4, 6, 5, 7, 6, 7, 4], jnp.int32)
    edge_index = jnp.stack([edge_src, edge_dst], axis=0)
    batch = jnp.array([0, 0, 0, 0, 1, 1, 1, 1], jnp.int32)

    params = (
        make_linear(k1, NUM_NODE_FEATURES, DIM_H),   # conv1
        make_linear(k2, DIM_H, DIM_H),               # conv2
        make_linear(k3, DIM_H, DIM_H),               # conv3
        make_linear(k4, DIM_H, NUM_CLASSES),         # lin
    )

    hg, logprob = gcn_forward(x, edge_index, batch, params,
                              num_graphs=NUM_GRAPHS, dim_h=DIM_H,
                              num_classes=NUM_CLASSES)
    jax.block_until_ready((hg, logprob))

    assert hg.shape == (NUM_GRAPHS, DIM_H)
    assert logprob.shape == (NUM_GRAPHS, NUM_CLASSES)

    ref_hg, ref_logprob = gcn_reference(x, edge_index, batch, params,
                                        num_graphs=NUM_GRAPHS)
    # bf16 adjacency/activations + f32 accumulation: loose tolerance vs f32 reference.
    assert bool(jnp.allclose(hg, ref_hg, rtol=5e-2, atol=5e-2))
    assert bool(jnp.allclose(logprob, ref_logprob, rtol=5e-2, atol=5e-2))
    assert bool(jnp.all(jnp.isfinite(logprob)))

    print("KERNEL_OK")
</pallas_src>

<mosaic_0001>
module attributes {stable_mosaic.version = 11 : i64} {
  func.func @gcn_conv_kernel(%arg0: i32, %arg1: i32, %arg2: memref<128x128xbf16, #tpu.memory_space<vmem>>, %arg3: memref<128x128xbf16, #tpu.memory_space<vmem>>, %arg4: memref<128x128xf32, #tpu.memory_space<vmem>>, %arg5: memref<1x128xf32, #tpu.memory_space<vmem>>, %arg6: memref<128x128xbf16, #tpu.memory_space<vmem>>, %arg7: memref<128x128xf32, #tpu.memory_space<vmem>>) attributes {dimension_semantics = [#tpu.dimension_semantics<parallel>, #tpu.dimension_semantics<arbitrary>], iteration_bounds = array<i64: 1, 1>, scalar_prefetch = 0 : i64, scratch_operands = 1 : i64, tpu.core_type = #tpu.core_type<tc>, window_params = [{transform_indices = @transform_0, window_bounds = array<i64: 128, 128>}, {transform_indices = @transform_1, window_bounds = array<i64: 128, 128>}, {pipeline_mode = #tpu.pipeline_mode<synchronous>, transform_indices = @transform_2, window_bounds = array<i64: 128, 128>}, {pipeline_mode = #tpu.pipeline_mode<synchronous>, transform_indices = @transform_3, window_bounds = array<i64: 1, 128>}, {transform_indices = @transform_4, window_bounds = array<i64: 128, 128>}]} {
    %c0_i32 = arith.constant 0 : i32
    %0 = arith.cmpi eq, %arg1, %c0_i32 : i32
    %1 = arith.extui %0 : i1 to i32
    %c0_i32_0 = arith.constant 0 : i32
    %2 = arith.cmpi ne, %1, %c0_i32_0 : i32
    scf.if %2 {
      %cst_10 = arith.constant 0.000000e+00 : f32
      %12 = vector.broadcast %cst_10 : f32 to vector<128x128xf32>
      %c0_11 = arith.constant 0 : index
      %c0_12 = arith.constant 0 : index
      %13 = vector.load %arg7[%c0_11, %c0_12] : memref<128x128xf32, #tpu.memory_space<vmem>>, vector<128x128xf32>
      tpu.vector_store %arg7[%c0_11, %c0_12], %12 {strides = array<i32>} : memref<128x128xf32, #tpu.memory_space<vmem>>, vector<128x128xf32>,
    } else {
    }
    %c0 = arith.constant 0 : index
    %c0_1 = arith.constant 0 : index
    %3 = vector.load %arg7[%c0, %c0_1] : memref<128x128xf32, #tpu.memory_space<vmem>>, vector<128x128xf32>
    %c0_2 = arith.constant 0 : index
    %c0_3 = arith.constant 0 : index
    %4 = vector.load %arg2[%c0_2, %c0_3] : memref<128x128xbf16, #tpu.memory_space<vmem>>, vector<128x128xbf16>
    %c0_4 = arith.constant 0 : index
    %c0_5 = arith.constant 0 : index
    %5 = vector.load %arg3[%c0_4, %c0_5] : memref<128x128xbf16, #tpu.memory_space<vmem>>, vector<128x128xbf16>
    %cst = arith.constant dense<0.000000e+00> : vector<128x128xf32>
    %6 = tpu.matmul %4, %5, %cst {dimension_numbers = #tpu.dot_dimension_numbers<[1], [0], [0], [1], [0, 0, 1, 1], [], []>} : vector<128x128xbf16>, vector<128x128xbf16>, vector<128x128xf32> -> vector<128x128xf32>
    %7 = arith.addf %3, %6 : vector<128x128xf32>
    %c0_6 = arith.constant 0 : index
    %c0_7 = arith.constant 0 : index
    %8 = vector.load %arg7[%c0_6, %c0_7] : memref<128x128xf32, #tpu.memory_space<vmem>>, vector<128x128xf32>
    tpu.vector_store %arg7[%c0_6, %c0_7], %7 {strides = array<i32>} : memref<128x128xf32, #tpu.memory_space<vmem>>, vector<128x128xf32>,
    %c0_i32_8 = arith.constant 0 : i32
    %9 = arith.cmpi eq, %arg1, %c0_i32_8 : i32
    %10 = arith.extui %9 : i1 to i32
    %c0_i32_9 = arith.constant 0 : i32
    %11 = arith.cmpi ne, %10, %c0_i32_9 : i32
    scf.if %11 {
      %c0_10 = arith.constant 0 : index
      %c0_11 = arith.constant 0 : index
      %12 = vector.load %arg7[%c0_10, %c0_11] : memref<128x128xf32, #tpu.memory_space<vmem>>, vector<128x128xf32>
      %c0_12 = arith.constant 0 : index
      %c0_13 = arith.constant 0 : index
      %13 = vector.load %arg4[%c0_12, %c0_13] : memref<128x128xf32, #tpu.memory_space<vmem>>, vector<128x128xf32>
      %cst_14 = arith.constant dense<0.000000e+00> : vector<128x128xf32>
      %14 = tpu.matmul %12, %13, %cst_14 {dimension_numbers = #tpu.dot_dimension_numbers<[1], [0], [0], [1], [0, 0, 1, 1], [], []>} : vector<128x128xf32>, vector<128x128xf32>, vector<128x128xf32> -> vector<128x128xf32>
      %c0_15 = arith.constant 0 : index
      %c0_16 = arith.constant 0 : index
      %15 = vector.load %arg5[%c0_15, %c0_16] : memref<1x128xf32, #tpu.memory_space<vmem>>, vector<1x128xf32>
      %16 = vector.broadcast %15 : vector<1x128xf32> to vector<128x128xf32>
      %17 = arith.addf %14, %16 : vector<128x128xf32>
      %cst_17 = arith.constant 0.000000e+00 : f32
      %18 = vector.broadcast %cst_17 : f32 to vector<128x128xf32>
      %19 = arith.maximumf %17, %18 : vector<128x128xf32>
      %20 = arith.truncf %19 : vector<128x128xf32> to vector<128x128xbf16>
      %c0_18 = arith.constant 0 : index
      %c0_19 = arith.constant 0 : index
      %21 = vector.load %arg6[%c0_18, %c0_19] : memref<128x128xbf16, #tpu.memory_space<vmem>>, vector<128x128xbf16>
      tpu.vector_store %arg6[%c0_18, %c0_19], %20 {strides = array<i32>} : memref<128x128xbf16, #tpu.memory_space<vmem>>, vector<128x128xbf16>,
    } else {
    }
    return
  }
  func.func @transform_0(%arg0: i32, %arg1: i32) -> (i32, i32) {
    %c0_i32 = arith.constant 0 : i32
    return %arg0, %arg1 : i32, i32
  }
  func.func @transform_1(%arg0: i32, %arg1: i32) -> (i32, i32) {
    %c0_i32 = arith.constant 0 : i32
    %c0_i32_0 = arith.constant 0 : i32
    return %arg1, %c0_i32 : i32, i32
  }
  func.func @transform_2(%arg0: i32, %arg1: i32) -> (i32, i32) {
    %c0_i32 = arith.constant 0 : i32
    %c0_i32_0 = arith.constant 0 : i32
    %c0_i32_1 = arith.constant 0 : i32
    return %c0_i32, %c0_i32_0 : i32, i32
  }
  func.func @transform_3(%arg0: i32, %arg1: i32) -> (i32, i32) {
    %c0_i32 = arith.constant 0 : i32
    %c0_i32_0 = arith.constant 0 : i32
    %c0_i32_1 = arith.constant 0 : i32
    return %c0_i32, %c0_i32_0 : i32, i32
  }
  func.func @transform_4(%arg0: i32, %arg1: i32) -> (i32, i32) {
    %c0_i32 = arith.constant 0 : i32
    %c0_i32_0 = arith.constant 0 : i32
    return %arg0, %c0_i32 : i32, i32
  }
}

</mosaic_0001>

<bundles_post_ra>
// kernel: tpu_custom_call.1
= control target key start
LH: loop header
LB: loop body
LE: loop exit
PB: predicated region body
PF: predicated region fallthrough
CT: control target
= control target key end

     0   :  { %9 = vsyncpa [#allocation4], 0  ;;  %s1136_s0 = inlined_call_operand.hbm [shape: bf16[128,128], index: 0, kind: input, shape index: {}]   ;;  %s1137_s1 = inlined_call_operand.hbm [shape: bf16[128,128], index: 1, kind: input, shape index: {}]   ;;  %s1138_s2 = inlined_call_operand.hbm [shape: f32[128,128], index: 2, kind: input, shape index: {}]   ;;  %s1139_s3 = inlined_call_operand.vmem [shape: f32[1,128], index: 3, kind: input, shape index: {}]   ;;  %s1140_s4 = inlined_call_operand.hbm [shape: bf16[128,128], index: 4, kind: output, shape index: {}]  }
   0x1   :  { %10 = vsyncpa [#allocation7], 0 }
   0x2   :  { %11 = vsyncpa [#allocation5], 0  ;;  %s1036_s15 = smov [#allocation6]   ;;  %s1037_s17 = smov [#allocation3]  }
   0x3   :  { %s29_s16 = sshll.u32 %s1036_s15, 4  ;;  %s17_s18 = sshll.u32 %s1037_s17, 4  ;;  %s30_s16 = int_to_ptr.vmem [resolvable:$true] %s29_s16  ;;  %s1069_s18 = int_to_ptr.vmem [resolvable:$true] %s17_s18 }
   0x4   :  { %s942_s21 = scalar_lea.hbm %s1137_s1, 1024 }
   0x5   :  { %p943_p0 = scmp.ne.s32.totalorder %s1137_s1, %s942_s21  ;;  %p946_p1 = scmp.lt.u32.totalorder %s942_s21, %s1137_s1 }
   0x7   :  { %p948_p2 = pnand %p946_p1, %p943_p0 }
   0x9   :  { %951 = shalt.err (!%p948_p2)
}
   0xa   :  { %s952_s26 = scalar_lea.vmem %s30_s16, 1024  ;;  %p957_p4 = scmp.lt.s32.totalorder %s30_s16, %s30_s16 }
   0xb   :  { %p953_p3 = scmp.ne.s32.totalorder %s30_s16, %s952_s26  ;;  %p958_p5 = scmp.lt.s32.totalorder %s952_s26, %s952_s26 }
   0xd   :  { %p959_p6 = por %p958_p5, %p957_p4 }
   0xf   :  { %p960_p7 = pnand %p959_p6, %p953_p3 }
  0x11   :  { %963 = shalt.err (!%p960_p7)
}
  0x12   :  { %s1038_s27 = smov 64   ;;  %s1039_s28 = smov 4  }
  0x13   :  { %35 = dma.hbm_to_vmem [thread:$0]  %s1137_s1, 1024, %s30_s16, [#allocation7], %s1038_s27, %s1038_s27, %s1039_s28  }
  0x14   :  { %s964_s7 = scalar_lea.hbm %s1136_s0, 1024 }
  0x15   :  { %p965_p8 = scmp.ne.s32.totalorder %s1136_s0, %s964_s7  ;;  %p968_p9 = scmp.lt.u32.totalorder %s964_s7, %s1136_s0 }
  0x17   :  { %p970_p10 = pnand %p968_p9, %p965_p8 }
  0x19   :  { %973 = shalt.err (!%p970_p10)
}
  0x1a   :  { %s974_s12 = scalar_lea.vmem %s1069_s18, 1024  ;;  %p979_p12 = scmp.lt.s32.totalorder %s1069_s18, %s1069_s18 }
  0x1b   :  { %p975_p11 = scmp.ne.s32.totalorder %s1069_s18, %s974_s12  ;;  %p980_p13 = scmp.lt.s32.totalorder %s974_s12, %s974_s12 }
  0x1d   :  { %p981_p0 = por %p980_p13, %p979_p12 }
  0x1f   :  { %p982_p1 = pnand %p981_p0, %p975_p11 }
  0x21   :  { %985 = shalt.err (!%p982_p1)
}
  0x22   :  { %23 = dma.hbm_to_vmem [thread:$0]  %s1136_s0, 1024, %s1069_s18, [#allocation4], %s1038_s27, %s1038_s27, %s1039_s28  }
  0x23   :  { %s1040_s14 = smov [#allocation8]   ;;  %s986_s19 = scalar_lea.hbm %s1138_s2, 2048 }
  0x24   :  { %s41_s15 = sshll.u32 %s1040_s14, 4  ;;  %p987_p2 = scmp.ne.s32.totalorder %s1138_s2, %s986_s19  ;;  %s42_s15 = int_to_ptr.vmem [resolvable:$true] %s41_s15 }
  0x25   :  { %p990_p3 = scmp.lt.u32.totalorder %s986_s19, %s1138_s2 }
  0x27   :  { %p992_p4 = pnand %p990_p3, %p987_p2 }
  0x29   :  { %995 = shalt.err (!%p992_p4)
}
  0x2a   :  { %s996_s24 = scalar_lea.vmem %s42_s15, 2048  ;;  %p1001_p6 = scmp.lt.s32.totalorder %s42_s15, %s42_s15 }
  0x2b   :  { %p997_p5 = scmp.ne.s32.totalorder %s42_s15, %s996_s24  ;;  %p1002_p7 = scmp.lt.s32.totalorder %s996_s24, %s996_s24 }
  0x2d   :  { %p1003_p8 = por %p1002_p7, %p1001_p6 }
  0x2f   :  { %p1004_p9 = pnand %p1003_p8, %p997_p5 }
  0x31   :  { %1007 = shalt.err (!%p1004_p9)
}
  0x32   :  { %s1041_s0 = smov 128   ;;  %s1042_s18 = smov 8  }
  0x33   :  { %47 = dma.hbm_to_vmem [thread:$0]  %s1138_s2, 2048, %s42_s15, [#allocation7], %s1041_s0, %s1041_s0, %s1042_s18  }
  0x34   :  { %1030 = dma.done.wait [#allocation4], 1024  }
  0x35   :  { %1031 = vsyncadd [#allocation4], 4294966272 }
  0x36   :  { %1032 = dma.done.wait [#allocation7], 3072  }
  0x37   :  { %1033 = vsyncadd [#allocation7], 4294964224  ;;  %v926_v0 = vld [vmem:[#allocation6] sm:$0xff]   ;;  %v927_v1 = vld [vmem:[#allocation6 + $0x8] sm:$0xff]  }
  0x38   :  { %798 = vmatprep.subr.bf16.mxu0 %v926_v0  ;;  %v928_v2 = vld [vmem:[#allocation6 + $0x10] sm:$0xff]   ;;  %v929_v3 = vld [vmem:[#allocation6 + $0x18] sm:$0xff]   ;;  %v934_v4 = vld [vmem:[#allocation3] sm:$0xff]  }
  0x39   :  { %799 = vmatpush3.bf16.msra.mxu0 %v926_v0  ;;  %814 = vmatprep.mubr.bf16.mxu0 %v934_v4  ;;  %v930_v5 = vld [vmem:[#allocation6 + $0x20] sm:$0xff]   ;;  %v931_v6 = vld [vmem:[#allocation6 + $0x28] sm:$0xff]   ;;  %v374_v9 = vld [vmem:[#allocation8 + $0x10] sm:$0xff] }
  0x3a   :  { %800 = vmatprep.subr.bf16.mxu0 %v927_v1  ;;  %v372_v7 = vld [vmem:[#allocation8] sm:$0xff]  ;;  %v373_v8 = vld [vmem:[#allocation8 + $0x8] sm:$0xff]  ;;  %v375_v11 = vld [vmem:[#allocation8 + $0x18] sm:$0xff] }
  0x3b   :  { %v886_v10 = vpack.c.bf16 %v373_v8, %v372_v7  ;;  %v890_v12 = vpack.c.bf16 %v375_v11, %v374_v9  ;;  %v376_v13 = vld [vmem:[#allocation8 + $0x20] sm:$0xff]  ;;  %v377_v14 = vld [vmem:[#allocation8 + $0x28] sm:$0xff]  ;;  %v932_v15 = vld [vmem:[#allocation6 + $0x30] sm:$0xff]  }
  0x3c   :  { %v894_v16 = vpack.c.bf16 %v377_v14, %v376_v13  ;;  %v378_v17 = vld [vmem:[#allocation8 + $0x30] sm:$0xff]  ;;  %v379_v18 = vld [vmem:[#allocation8 + $0x38] sm:$0xff]  ;;  %v380_v21 = vld [vmem:[#allocation8 + $0x40] sm:$0xff] }
  0x3d   :  { %801 = vmatpush3.bf16.msra.mxu0 %v927_v1  ;;  %887 = vmatprep.subr.bf16.mxu1 %v886_v10  ;;  %v933_v19 = vld [vmem:[#allocation6 + $0x38] sm:$0xff]   ;;  %v898_v20 = vpack.c.bf16 %v379_v18, %v378_v17  ;;  %v381_v22 = vld [vmem:[#allocation8 + $0x48] sm:$0xff]  ;;  %v382_v25 = vld [vmem:[#allocation8 + $0x50] sm:$0xff] }
  0x3e   :  { %802 = vmatprep.subr.bf16.mxu0 %v928_v2  ;;  %889 = vmatpush3.bf16.msra.mxu1 %v886_v10  ;;  %v902_v23 = vpack.c.bf16 %v381_v22, %v380_v21  ;;  %v935_v24 = vld [vmem:[#allocation3 + $0x8] sm:$0xff]   ;;  %v383_v26 = vld [vmem:[#allocation8 + $0x58] sm:$0xff]  ;;  %v936_v27 = vld [vmem:[#allocation3 + $0x10] sm:$0xff]  }
  0x3f   :  { %891 = vmatprep.subr.bf16.mxu1 %v890_v12  ;;  %v906_v28 = vpack.c.bf16 %v383_v26, %v382_v25  ;;  %v384_v29 = vld [vmem:[#allocation8 + $0x60] sm:$0xff]  ;;  %v385_v30 = vld [vmem:[#allocation8 + $0x68] sm:$0xff]  ;;  %v937_v32 = vld [vmem:[#allocation3 + $0x18] sm:$0xff]  }
  0x40   :  { %v910_v31 = vpack.c.bf16 %v385_v30, %v384_v29  ;;  %v938_v33 = vld [vmem:[#allocation3 + $0x20] sm:$0xff]   ;;  %v939_v34 = vld [vmem:[#allocation3 + $0x28] sm:$0xff]   ;;  %v940_v35 = vld [vmem:[#allocation3 + $0x30] sm:$0xff]  }
  0x41   :  { %803 = vmatpush3.bf16.msra.mxu0 %v928_v2  ;;  %v941_v36 = vld [vmem:[#allocation3 + $0x38] sm:$0xff]   ;;  %v386_v37 = vld [vmem:[#allocation8 + $0x70] sm:$0xff]  ;;  %v670_v56 = vld [vmem:[%s1139_s3] ss:$0 sm:$0xff]  ;;  %s1043_s3 = smov [#allocation9]  }
  0x42   :  { %804 = vmatprep.subr.bf16.mxu0 %v929_v3  ;;  %893 = vmatpush3.bf16.msra.mxu1 %v890_v12  ;;  %v387_v38 = vld [vmem:[#allocation8 + $0x78] sm:$0xff]  ;;  %s641_s30 = sshll.u32 %s1043_s3, 4  ;;  %s642_s30 = int_to_ptr.vmem [resolvable:$true] %s641_s30 }
  0x43   :  { %895 = vmatprep.subr.bf16.mxu1 %v894_v16  ;;  %v914_v39 = vpack.c.bf16 %v387_v38, %v386_v37  ;;  %s1008_s5 = scalar_lea.vmem %s642_s30, 1024  ;;  %p1013_p11 = scmp.lt.s32.totalorder %s642_s30, %s642_s30 }
  0x44   :  { %p1009_p10 = scmp.ne.s32.totalorder %s642_s30, %s1008_s5  ;;  %p1014_p12 = scmp.lt.s32.totalorder %s1008_s5, %s1008_s5 }
  0x45   :  { %805 = vmatpush3.bf16.msra.mxu0 %v929_v3 }
  0x46   :  { %806 = vmatprep.subr.bf16.mxu0 %v930_v5  ;;  %897 = vmatpush3.bf16.msra.mxu1 %v894_v16  ;;  %p1015_p13 = por %p1014_p12, %p1013_p11 }
  0x47   :  { %899 = vmatprep.subr.bf16.mxu1 %v898_v20 }
  0x48   :  { %p1016_p0 = pnand %p1015_p13, %p1009_p10 }
  0x49   :  { %807 = vmatpush3.bf16.msra.mxu0 %v930_v5 }
  0x4a   :  { %808 = vmatprep.subr.bf16.mxu0 %v931_v6  ;;  %901 = vmatpush3.bf16.msra.mxu1 %v898_v20 }
  0x4b   :  { %903 = vmatprep.subr.bf16.mxu1 %v902_v23 }
  0x4d   :  { %809 = vmatpush3.bf16.msra.mxu0 %v931_v6 }
  0x4e   :  { %810 = vmatprep.subr.bf16.mxu0 %v932_v15  ;;  %905 = vmatpush3.bf16.msra.mxu1 %v902_v23 }
  0x4f   :  { %907 = vmatprep.subr.bf16.mxu1 %v906_v28 }
  0x51   :  { %811 = vmatpush3.bf16.msra.mxu0 %v932_v15 }
  0x52   :  { %812 = vmatprep.subr.bf16.mxu0 %v933_v19  ;;  %909 = vmatpush3.bf16.msra.mxu1 %v906_v28 }
  0x53   :  { %911 = vmatprep.subr.bf16.mxu1 %v910_v31 }
  0x55   :  { %813 = vmatpush3.bf16.msra.mxu0 %v933_v19 }
  0x56   :  { %913 = vmatpush3.bf16.msra.mxu1 %v910_v31 }
  0x57   :  { %915 = vmatprep.subr.bf16.mxu1 %v914_v39 }
  0x58   :  { %815 = vmatmul.mubr.bf16.vlgmr.msra.gmra.mrb[0].mxu0 %v935_v24 }
  0x59   :  { %818 = vmatprep.mubr.bf16.mxu0 %v936_v27 }
  0x5a   :  { %917 = vmatpush3.bf16.msra.mxu1 %v914_v39 }
  0x60   :  { %819 = vmatmul.mubr.bf16.gmra.mrb[4].mxu0 %v937_v32 }
  0x61   :  { %822 = vmatprep.mubr.bf16.mxu0 %v938_v33 }
  0x68   :  { %823 = vmatmul.mubr.bf16.gmra.mrb[8].mxu0 %v939_v34 }
  0x69   :  { %826 = vmatprep.mubr.bf16.mxu0 %v940_v35 }
  0x70   :  { %827 = vmatmul.mubr.bf16.gmra.mrb[12].mxu0 %v941_v36 }
 0x12b   :  { %v816_v40 = vpop.f32.mrb[0].mxu0 }
 0x12c   :  { %v258_v41 = vpop.f32.mrb[1].mxu0 }
 0x12d   :  { %v817_v42 = vpop.f32.mrb[2].mxu0  ;;  %862 = vmatprep.mubr.f32.mxu1 %v258_v41 }
 0x12e   :  { %v261_v43 = vpop.f32.mrb[3].mxu0 }
 0x12f   :  { %863 = vmatmul.mubr.f32.vlgmr.msra.gmra.mrb[0].mxu1 %v261_v43 }
 0x130   :  { %865 = vmatprep.mubr.f32.mxu1 %v816_v40 }
 0x133   :  { %v820_v44 = vpop.f32.mrb[4].mxu0  ;;  %866 = vmatmul.mubr.f32.gmra.mrb[2].mxu1 %v817_v42 }
 0x134   :  { %v274_v45 = vpop.f32.mrb[5].mxu0 }
 0x135   :  { %v821_v46 = vpop.f32.mrb[6].mxu0  ;;  %868 = vmatprep.mubr.f32.mxu1 %v274_v45 }
 0x136   :  { %v277_v47 = vpop.f32.mrb[7].mxu0 }
 0x137   :  { %869 = vmatmul.mubr.f32.gmra.mrb[4].mxu1 %v277_v47 }
 0x138   :  { %871 = vmatprep.mubr.f32.mxu1 %v820_v44 }
 0x13b   :  { %v824_v48 = vpop.f32.mrb[8].mxu0  ;;  %872 = vmatmul.mubr.f32.gmra.mrb[6].mxu1 %v821_v46 }
 0x13c   :  { %v290_v49 = vpop.f32.mrb[9].mxu0 }
 0x13d   :  { %v825_v50 = vpop.f32.mrb[10].mxu0  ;;  %874 = vmatprep.mubr.f32.mxu1 %v290_v49 }
 0x13e   :  { %v293_v51 = vpop.f32.mrb[11].mxu0 }
 0x13f   :  { %875 = vmatmul.mubr.f32.gmra.mrb[8].mxu1 %v293_v51 }
 0x140   :  { %877 = vmatprep.mubr.f32.mxu1 %v824_v48 }
 0x143   :  { %v828_v52 = vpop.f32.mrb[12].mxu0  ;;  %878 = vmatmul.mubr.f32.gmra.mrb[10].mxu1 %v825_v50 }
 0x144   :  { %v306_v53 = vpop.f32.mrb[13].mxu0 }
 0x145   :  { %v829_v54 = vpop.f32.mrb[14].mxu0  ;;  %880 = vmatprep.mubr.f32.mxu1 %v306_v53 }
 0x146   :  { %v309_v55 = vpop.f32.mrb[15].mxu0 }
 0x147   :  { %881 = vmatmul.mubr.f32.gmra.mrb[12].mxu1 %v309_v55 }
 0x148   :  { %883 = vmatprep.mubr.f32.mxu1 %v828_v52 }
 0x14b   :  { %884 = vmatmul.mubr.f32.gmra.mrb[14].mxu1 %v829_v54 }
 0x202   :  { %v864_v57 = vpop.f32.mrb[0].mxu1 }
 0x203   :  { %v467_v58 = vadd.f32 %v864_v57, %v670_v56  ;;  %v461_v59 = vpop.f32.mrb[1].mxu1 }
 0x204   :  { %v462_v60 = vadd.f32 %v670_v56, %v461_v59 }
 0x205   :  { %v541_v61 = vmax.f32 %v467_v58, 0.0 }
 0x206   :  { %v540_v62 = vmax.f32 %v462_v60, 0.0  ;;  %v867_v63 = vpop.f32.mrb[2].mxu1 }
 0x207   :  { %v477_v0 = vadd.f32 %v867_v63, %v670_v56  ;;  %v471_v1 = vpop.f32.mrb[3].mxu1 }
 0x208   :  { %v706_v2 = vpack.c.bf16 %v541_v61, %v540_v62  ;;  %v472_v3 = vadd.f32 %v670_v56, %v471_v1 }
 0x209   :  { %v543_v4 = vmax.f32 %v477_v0, 0.0 }
 0x20a   :  { %707 = vst [vmem:[#allocation9] sm:$0xff] %v706_v2   ;;  %v542_v5 = vmax.f32 %v472_v3, 0.0  ;;  %v870_v6 = vpop.f32.mrb[4].mxu1 }
 0x20b   :  { %v487_v7 = vadd.f32 %v870_v6, %v670_v56  ;;  %v481_v8 = vpop.f32.mrb[5].mxu1 }
 0x20c   :  { %v711_v9 = vpack.c.bf16 %v543_v4, %v542_v5  ;;  %v482_v10 = vadd.f32 %v670_v56, %v481_v8 }
 0x20d   :  { %v545_v11 = vmax.f32 %v487_v7, 0.0 }
 0x20e   :  { %743 = vst [vmem:[#allocation9 + $0x8] sm:$0xff] %v711_v9   ;;  %v544_v12 = vmax.f32 %v482_v10, 0.0  ;;  %v873_v13 = vpop.f32.mrb[6].mxu1 }
 0x20f   :  { %v497_v14 = vadd.f32 %v873_v13, %v670_v56  ;;  %v491_v15 = vpop.f32.mrb[7].mxu1 }
 0x210   :  { %v716_v16 = vpack.c.bf16 %v545_v11, %v544_v12  ;;  %v492_v17 = vadd.f32 %v670_v56, %v491_v15 }
 0x211   :  { %v547_v18 = vmax.f32 %v497_v14, 0.0 }
 0x212   :  { %744 = vst [vmem:[#allocation9 + $0x10] sm:$0xff] %v716_v16   ;;  %v546_v19 = vmax.f32 %v492_v17, 0.0  ;;  %v876_v20 = vpop.f32.mrb[8].mxu1 }
 0x213   :  { %v507_v21 = vadd.f32 %v876_v20, %v670_v56  ;;  %v501_v22 = vpop.f32.mrb[9].mxu1 }
 0x214   :  { %v721_v23 = vpack.c.bf16 %v547_v18, %v546_v19  ;;  %v502_v24 = vadd.f32 %v670_v56, %v501_v22 }
 0x215   :  { %v549_v25 = vmax.f32 %v507_v21, 0.0 }
 0x216   :  { %745 = vst [vmem:[#allocation9 + $0x18] sm:$0xff] %v721_v23   ;;  %v548_v26 = vmax.f32 %v502_v24, 0.0  ;;  %v879_v27 = vpop.f32.mrb[10].mxu1 }
 0x217   :  { %v517_v28 = vadd.f32 %v879_v27, %v670_v56  ;;  %v511_v29 = vpop.f32.mrb[11].mxu1 }
 0x218   :  { %v726_v30 = vpack.c.bf16 %v549_v25, %v548_v26  ;;  %v512_v31 = vadd.f32 %v670_v56, %v511_v29 }
 0x219   :  { %v551_v32 = vmax.f32 %v517_v28, 0.0 }
 0x21a   :  { %746 = vst [vmem:[#allocation9 + $0x20] sm:$0xff] %v726_v30   ;;  %v550_v33 = vmax.f32 %v512_v31, 0.0  ;;  %v882_v34 = vpop.f32.mrb[12].mxu1 }
 0x21b   :  { %v527_v35 = vadd.f32 %v882_v34, %v670_v56  ;;  %v521_v36 = vpop.f32.mrb[13].mxu1 }
 0x21c   :  { %v731_v37 = vpack.c.bf16 %v551_v32, %v550_v33  ;;  %v522_v38 = vadd.f32 %v670_v56, %v521_v36 }
 0x21d   :  { %v553_v39 = vmax.f32 %v527_v35, 0.0 }
 0x21e   :  { %747 = vst [vmem:[#allocation9 + $0x28] sm:$0xff] %v731_v37   ;;  %v552_v40 = vmax.f32 %v522_v38, 0.0  ;;  %v885_v41 = vpop.f32.mrb[14].mxu1 }
 0x21f   :  { %v537_v42 = vadd.f32 %v885_v41, %v670_v56  ;;  %v531_v43 = vpop.f32.mrb[15].mxu1 }
 0x220   :  { %v736_v44 = vpack.c.bf16 %v553_v39, %v552_v40  ;;  %v532_v45 = vadd.f32 %v670_v56, %v531_v43 }
 0x221   :  { %v555_v46 = vmax.f32 %v537_v42, 0.0 }
 0x222   :  { %748 = vst [vmem:[#allocation9 + $0x30] sm:$0xff] %v736_v44   ;;  %v554_v47 = vmax.f32 %v532_v45, 0.0 }
 0x224   :  { %v741_v48 = vpack.c.bf16 %v555_v46, %v554_v47 }
 0x226   :  { %749 = vst [vmem:[#allocation9 + $0x38] sm:$0xff] %v741_v48  }
 0x227   :  { %1019 = shalt.err (!%p1016_p0)
}
 0x228   :  { %s1020_s8 = scalar_lea.hbm %s1140_s4, 1024 }
 0x229   :  { %p1021_p1 = scmp.ne.s32.totalorder %s1140_s4, %s1020_s8  ;;  %p1024_p2 = scmp.lt.u32.totalorder %s1020_s8, %s1140_s4 }
 0x22b   :  { %p1026_p3 = pnand %p1024_p2, %p1021_p1 }
 0x22d   :  { %1029 = shalt.err (!%p1026_p3)
}
 0x22e   :  { %647 = dma.vmem_to_hbm [thread:$0]  %s642_s30, 1024, %s1140_s4, [#allocation5], %s1038_s27, %s1038_s27, %s1039_s28  }
 0x22f   :  { %1034 = dma.done.wait [#allocation5], 1024  }
 0x230   :  { %1035 = vsyncadd [#allocation5], 4294966272 }
 0x231   :  { %651 = vsyncpa [#allocation4], 1 }
 0x232   :  { %652 = vsyncpa [#allocation7], 1 }
 0x233   :  { %653 = vsyncpa [#allocation5], 1 }

</bundles_post_ra>
